<compile_context>
chip_gen: v5e
topology: v5e:2x2
jax: 0.10.0
libtpu: 0.0.40
codegen_flags: <defaults>
</compile_context>

<pallas_src>
import jax
import jax.numpy as jnp
from jax.experimental import pallas as pl
from jax.experimental.pallas import tpu as pltpu

IN_DIM = 4
HIDDEN = 128
HEAD_PAD = 8  # action(2) + value(1), padded to a full 8-sublane output slab


def _round_up(n, m):
    return ((n + m - 1) // m) * m


def _a2c_kernel(xt_ref, w1_ref, b1_ref, wh_ref, bh_ref, out_ref):
    xt = xt_ref[...]    # (4, TB)   lane-dense input tile
    w1 = w1_ref[...]    # (128, 4)  fc1 weight (PyTorch (out, in) layout)
    # fc1 as 4 VPU outer-product FMAs (K=4 on the MXU would be ~97% zero pad).
    # Bias (128,1) is the accumulator init; xt rows broadcast over sublanes.
    h = b1_ref[...] + w1[:, 0:1] * xt[0:1, :]
    h = h + w1[:, 1:2] * xt[1:2, :]
    h = h + w1[:, 2:3] * xt[2:3, :]
    h = h + w1[:, 3:4] * xt[3:4, :]
    h = jnp.maximum(h, 0.0)                              # (128, TB) = relu(fc1)^T
    # Fused action+value heads on the MXU: (8,128) @ (128,TB) -> (8,TB),
    # lane-dense store (no masked partial stores, tiny HBM writeback).
    out_ref[...] = (
        jnp.dot(wh_ref[...], h, preferred_element_type=jnp.float32)
        + bh_ref[...]
    ).astype(out_ref.dtype)


def prepare_params(raw_params):
    """One-time fusion of the two heads into a single (8,128)/(8,1) slab.

    raw_params are in the PyTorch nn.Linear layout:
      w1 (128,4), b1 (128,), wv (1,128), bv (1,), wa (2,128), ba (2,)
    """
    w1, b1, wv, bv, wa, ba = raw_params
    f32 = jnp.float32
    w1 = w1.astype(f32)                                    # (128, 4)
    b1 = b1.astype(f32).reshape(HIDDEN, 1)                 # (128, 1)
    wh = jnp.concatenate(
        [wa.astype(f32), wv.astype(f32),
         jnp.zeros((HEAD_PAD - 3, HIDDEN), f32)], axis=0)  # (8, 128)
    bh = jnp.concatenate(
        [ba.astype(f32), bv.astype(f32),
         jnp.zeros((HEAD_PAD - 3,), f32)]).reshape(HEAD_PAD, 1)  # (8, 1)
    return w1, b1, wh, bh


def a2c_gym_forward(x, prepped_params, tb=1024):
    """Returns (action:(B,2), value:(B,1)) matching the PyTorch module."""
    w1, b1, wh, bh = prepped_params
    x2 = jnp.reshape(x, (-1, IN_DIM)).astype(jnp.float32)
    B = x2.shape[0]

    # Lane-dense transposed input: (4, B). Pad batch (lane) dim to the tile.
    xt = x2.T

    # Batch tile must be a multiple of 128 (lane dim of both x and out slabs).
    bp128 = _round_up(max(B, 1), 128)
    tb = min(tb, bp128)
    # v7x megacore: keep >= 2 grid steps when the batch is big enough so the
    # "parallel" grid axis can be sharded across both TensorCores.
    if bp128 >= 2 * 128:
        tb = min(tb, _round_up(-(-bp128 // 2), 128))
    bp = _round_up(B, tb)
    if bp != B:
        xt = jnp.pad(xt, ((0, 0), (0, bp - B)))

    # Per-step VMEM @ tb=1024: x tile 32 KiB + out tile 32 KiB (x2 double
    # buffering) + ~7 KiB resident weights + ~0.5 MiB h intermediate ->
    # far under every chip's scoped VMEM limit.
    out_t = pl.pallas_call(
        _a2c_kernel,
        out_shape=jax.ShapeDtypeStruct((HEAD_PAD, bp), jnp.float32),
        grid=(bp // tb,),
        in_specs=[
            pl.BlockSpec((IN_DIM, tb), lambda i: (0, i)),        # x^T tile
            pl.BlockSpec((HIDDEN, IN_DIM), lambda i: (0, 0)),    # w1 (resident)
            pl.BlockSpec((HIDDEN, 1), lambda i: (0, 0)),         # b1 (resident)
            pl.BlockSpec((HEAD_PAD, HIDDEN), lambda i: (0, 0)),  # fused head W
            pl.BlockSpec((HEAD_PAD, 1), lambda i: (0, 0)),       # fused head b
        ],
        out_specs=pl.BlockSpec((HEAD_PAD, tb), lambda i: (0, i)),
        compiler_params=pltpu.CompilerParams(
            dimension_semantics=("parallel",)),  # megacore split on v7x
    )(xt, w1, b1, wh, bh)

    # Tiny wrapper-side slice + transpose back to the PyTorch output layout.
    action = out_t[0:2, :B].T    # (B, 2)
    value = out_t[2:3, :B].T     # (B, 1)
    return action, value


def init_params(key):
    """Deterministic init matching PyTorch nn.Linear defaults: U(+-1/sqrt(fan_in)).

    Weights stored in the PyTorch (out_features, in_features) layout.
    """
    k1, k2, k3, k4, k5, k6 = jax.random.split(key, 6)

    def uniform(k, shape, fan_in):
        bound = 1.0 / jnp.sqrt(fan_in)
        return jax.random.uniform(k, shape, jnp.float32, -bound, bound)

    w1 = uniform(k1, (128, 4), 4.0)      # fc1 weight
    b1 = uniform(k2, (128,), 4.0)        # fc1 bias
    wv = uniform(k3, (1, 128), 128.0)    # value_network weight
    bv = uniform(k4, (1,), 128.0)        # value_network bias
    wa = uniform(k5, (2, 128), 128.0)    # action_policy weight
    ba = uniform(k6, (2,), 128.0)        # action_policy bias
    return (w1, b1, wv, bv, wa, ba)


def reference_forward(x, raw_params):
    w1, b1, wv, bv, wa, ba = raw_params
    x2 = jnp.reshape(x, (-1, IN_DIM)).astype(jnp.float32)
    hp = jax.lax.Precision.HIGHEST
    h = jnp.maximum(jnp.dot(x2, w1.T, precision=hp) + b1, 0.0)
    action = jnp.dot(h, wa.T, precision=hp) + ba
    value = jnp.dot(h, wv.T, precision=hp) + bv
    return action, value


if __name__ == "__main__":
    key = jax.random.PRNGKey(0)
    pkey, k1, k2 = jax.random.split(key, 3)
    raw_params = init_params(pkey)
    # Head fusion / padding hoisted out of the per-call forward (done once).
    prepped = prepare_params(raw_params)

    fwd = jax.jit(a2c_gym_forward)

    # Case 1: gym-style observation tensor, reshaped to (-1, 4) -> 512 rows
    #         (exercises the multi-step grid / megacore path).
    x_a = jax.random.normal(k1, (2, 4, 16, 16), jnp.float32)
    # Case 2: small ragged batch (10 rows) exercising the padded-tail path.
    x_b = jax.random.normal(k2, (10, 4), jnp.float32)

    for x in (x_a, x_b):
        action, value = jax.block_until_ready(fwd(x, prepped))
        ref_action, ref_value = reference_forward(x, raw_params)
        assert action.shape == ref_action.shape
        assert value.shape == ref_value.shape
        assert jnp.allclose(action, ref_action, atol=1e-4, rtol=1e-4)
        assert jnp.allclose(value, ref_value, atol=1e-4, rtol=1e-4)

    print("KERNEL_OK")
</pallas_src>

<mosaic_0001>
module attributes {stable_mosaic.version = 11 : i64} {
  func.func @_a2c_kernel(%arg0: i32, %arg1: memref<4x256xf32, #tpu.memory_space<vmem>>, %arg2: memref<128x4xf32, #tpu.memory_space<vmem>>, %arg3: memref<128x1xf32, #tpu.memory_space<vmem>>, %arg4: memref<8x128xf32, #tpu.memory_space<vmem>>, %arg5: memref<8x1xf32, #tpu.memory_space<vmem>>, %arg6: memref<8x256xf32, #tpu.memory_space<vmem>>) attributes {dimension_semantics = [#tpu.dimension_semantics<parallel>], iteration_bounds = array<i64: 2>, scalar_prefetch = 0 : i64, scratch_operands = 0 : i64, tpu.core_type = #tpu.core_type<tc>, window_params = [{transform_indices = @transform_0, window_bounds = array<i64: 4, 256>}, {pipeline_mode = #tpu.pipeline_mode<synchronous>, transform_indices = @transform_1, window_bounds = array<i64: 128, 4>}, {pipeline_mode = #tpu.pipeline_mode<synchronous>, transform_indices = @transform_2, window_bounds = array<i64: 128, 1>}, {pipeline_mode = #tpu.pipeline_mode<synchronous>, transform_indices = @transform_3, window_bounds = array<i64: 8, 128>}, {pipeline_mode = #tpu.pipeline_mode<synchronous>, transform_indices = @transform_4, window_bounds = array<i64: 8, 1>}, {transform_indices = @transform_5, window_bounds = array<i64: 8, 256>}]} {
    %c0 = arith.constant 0 : index
    %c0_0 = arith.constant 0 : index
    %0 = vector.load %arg1[%c0, %c0_0] : memref<4x256xf32, #tpu.memory_space<vmem>>, vector<4x256xf32>
    %c0_1 = arith.constant 0 : index
    %c0_2 = arith.constant 0 : index
    %1 = vector.load %arg2[%c0_1, %c0_2] : memref<128x4xf32, #tpu.memory_space<vmem>>, vector<128x4xf32>
    %c0_3 = arith.constant 0 : index
    %c0_4 = arith.constant 0 : index
    %2 = vector.load %arg3[%c0_3, %c0_4] : memref<128x1xf32, #tpu.memory_space<vmem>>, vector<128x1xf32>
    %3 = vector.extract_strided_slice %1 {offsets = [0, 0], sizes = [128, 1], strides = [1, 1]} : vector<128x4xf32> to vector<128x1xf32>
    %4 = vector.extract_strided_slice %0 {offsets = [0, 0], sizes = [1, 256], strides = [1, 1]} : vector<4x256xf32> to vector<1x256xf32>
    %5 = vector.broadcast %3 : vector<128x1xf32> to vector<128x256xf32>
    %6 = vector.broadcast %4 : vector<1x256xf32> to vector<128x256xf32>
    %7 = arith.mulf %5, %6 : vector<128x256xf32>
    %8 = vector.broadcast %2 : vector<128x1xf32> to vector<128x256xf32>
    %9 = arith.addf %8, %7 : vector<128x256xf32>
    %10 = vector.extract_strided_slice %1 {offsets = [0, 1], sizes = [128, 1], strides = [1, 1]} : vector<128x4xf32> to vector<128x1xf32>
    %11 = vector.extract_strided_slice %0 {offsets = [1, 0], sizes = [1, 256], strides = [1, 1]} : vector<4x256xf32> to vector<1x256xf32>
    %12 = vector.broadcast %10 : vector<128x1xf32> to vector<128x256xf32>
    %13 = vector.broadcast %11 : vector<1x256xf32> to vector<128x256xf32>
    %14 = arith.mulf %12, %13 : vector<128x256xf32>
    %15 = arith.addf %9, %14 : vector<128x256xf32>
    %16 = vector.extract_strided_slice %1 {offsets = [0, 2], sizes = [128, 1], strides = [1, 1]} : vector<128x4xf32> to vector<128x1xf32>
    %17 = vector.extract_strided_slice %0 {offsets = [2, 0], sizes = [1, 256], strides = [1, 1]} : vector<4x256xf32> to vector<1x256xf32>
    %18 = vector.broadcast %16 : vector<128x1xf32> to vector<128x256xf32>
    %19 = vector.broadcast %17 : vector<1x256xf32> to vector<128x256xf32>
    %20 = arith.mulf %18, %19 : vector<128x256xf32>
    %21 = arith.addf %15, %20 : vector<128x256xf32>
    %22 = vector.extract_strided_slice %1 {offsets = [0, 3], sizes = [128, 1], strides = [1, 1]} : vector<128x4xf32> to vector<128x1xf32>
    %23 = vector.extract_strided_slice %0 {offsets = [3, 0], sizes = [1, 256], strides = [1, 1]} : vector<4x256xf32> to vector<1x256xf32>
    %24 = vector.broadcast %22 : vector<128x1xf32> to vector<128x256xf32>
    %25 = vector.broadcast %23 : vector<1x256xf32> to vector<128x256xf32>
    %26 = arith.mulf %24, %25 : vector<128x256xf32>
    %27 = arith.addf %21, %26 : vector<128x256xf32>
    %cst = arith.constant 0.000000e+00 : f32
    %28 = vector.broadcast %cst : f32 to vector<128x256xf32>
    %29 = arith.maximumf %27, %28 : vector<128x256xf32>
    %c0_5 = arith.constant 0 : index
    %c0_6 = arith.constant 0 : index
    %30 = vector.load %arg4[%c0_5, %c0_6] : memref<8x128xf32, #tpu.memory_space<vmem>>, vector<8x128xf32>
    %cst_7 = arith.constant dense<0.000000e+00> : vector<8x256xf32>
    %31 = tpu.matmul %30, %29, %cst_7 {dimension_numbers = #tpu.dot_dimension_numbers<[1], [0], [0], [1], [0, 0, 1, 1], [], []>} : vector<8x128xf32>, vector<128x256xf32>, vector<8x256xf32> -> vector<8x256xf32>
    %c0_8 = arith.constant 0 : index
    %c0_9 = arith.constant 0 : index
    %32 = vector.load %arg5[%c0_8, %c0_9] : memref<8x1xf32, #tpu.memory_space<vmem>>, vector<8x1xf32>
    %33 = vector.broadcast %32 : vector<8x1xf32> to vector<8x256xf32>
    %34 = arith.addf %31, %33 : vector<8x256xf32>
    %c0_10 = arith.constant 0 : index
    %c0_11 = arith.constant 0 : index
    %35 = vector.load %arg6[%c0_10, %c0_11] : memref<8x256xf32, #tpu.memory_space<vmem>>, vector<8x256xf32>
    tpu.vector_store %arg6[%c0_10, %c0_11], %34 {strides = array<i32>} : memref<8x256xf32, #tpu.memory_space<vmem>>, vector<8x256xf32>,
    return
  }
  func.func @transform_0(%arg0: i32) -> (i32, i32) {
    %c0_i32 = arith.constant 0 : i32
    %c0_i32_0 = arith.constant 0 : i32
    return %c0_i32, %arg0 : i32, i32
  }
  func.func @transform_1(%arg0: i32) -> (i32, i32) {
    %c0_i32 = arith.constant 0 : i32
    %c0_i32_0 = arith.constant 0 : i32
    %c0_i32_1 = arith.constant 0 : i32
    return %c0_i32, %c0_i32_0 : i32, i32
  }
  func.func @transform_2(%arg0: i32) -> (i32, i32) {
    %c0_i32 = arith.constant 0 : i32
    %c0_i32_0 = arith.constant 0 : i32
    %c0_i32_1 = arith.constant 0 : i32
    return %c0_i32, %c0_i32_0 : i32, i32
  }
  func.func @transform_3(%arg0: i32) -> (i32, i32) {
    %c0_i32 = arith.constant 0 : i32
    %c0_i32_0 = arith.constant 0 : i32
    %c0_i32_1 = arith.constant 0 : i32
    return %c0_i32, %c0_i32_0 : i32, i32
  }
  func.func @transform_4(%arg0: i32) -> (i32, i32) {
    %c0_i32 = arith.constant 0 : i32
    %c0_i32_0 = arith.constant 0 : i32
    %c0_i32_1 = arith.constant 0 : i32
    return %c0_i32, %c0_i32_0 : i32, i32
  }
  func.func @transform_5(%arg0: i32) -> (i32, i32) {
    %c0_i32 = arith.constant 0 : i32
    %c0_i32_0 = arith.constant 0 : i32
    return %c0_i32, %arg0 : i32, i32
  }
}

</mosaic_0001>

<bundles_post_ra>
// kernel: a2c_gym_forward.1
= control target key start
LH: loop header
LB: loop body
LE: loop exit
PB: predicated region body
PF: predicated region fallthrough
CT: control target
= control target key end

     0   :  { %s1120_s18 = smov 0   ;;  %s1706_s0 = inlined_call_operand.vmem [shape: f32[4,512], index: 0, kind: input, shape index: {}]   ;;  %s1707_s1 = inlined_call_operand.vmem [shape: f32[128,4], index: 1, kind: input, shape index: {}]   ;;  %s1708_s2 = inlined_call_operand.vmem [shape: f32[128,1], index: 2, kind: input, shape index: {}]   ;;  %s1709_s3 = inlined_call_operand.vmem [shape: f32[8,128], index: 3, kind: input, shape index: {}]   ;;  %s1710_s4 = inlined_call_operand.vmem [shape: f32[8,1], index: 4, kind: input, shape index: {}]   ;;  %s1711_s5 = inlined_call_operand.vmem [shape: f32[8,512], index: 5, kind: output, shape index: {}]  }
   0x1 LB: > { %s1031_s19 = sadd.s32 4294967295, %s1084_s18   ;;  %p1035_p0 = scmp.ge.s32.totalorder %s1084_s18, 1  ;;  %s1084_s18 = sphi %s1120_s18, %s15_s18  }
   0x2   : > { %p188_p1 = scmp.lt.s32.totalorder %s1084_s18, 3 }
   0x4   : > { %p189_p2 = pnand %p1035_p0, %p188_p1 }
   0x6   : > { %192 = sbr.rel (%p189_p2) target bundleno = 499 (0x1f3), region = 40 }
   0xb   : > { %v1131_v0 = vld [vmem:[%s1707_s1 + $0x20] sm:$0xff]  ;;  %v1136_v1 = vld [vmem:[%s1707_s1 + $0x10] sm:$0xff]  ;;  %v1086_v3 = vmov 0   ;;  %v1152_v4 = vld [vmem:[%s1707_s1 + $0x28] sm:$0xff]  ;;  %v1087_v33 = vmov 1   ;;  %s1036_s13 = sshll.u32 %s1031_s19, 1 }
   0xc   : > { %v1141_v2 = vld [vmem:[%s1707_s1] sm:$0xff]  ;;  %1056 = vset.pattern.permute.xlu2 %v1086_v3  ;;  %1055 = vset.pattern.permute.xlu1 %v1086_v3  ;;  %v1157_v5 = vld [vmem:[%s1707_s1 + $0x18] sm:$0xff]  ;;  %v1162_v6 = vld [vmem:[%s1707_s1 + $0x8] sm:$0xff]  ;;  %p217_p3 = scmp.lt.s32.totalorder %s1036_s13, 3  ;;  %v1088_v50 = vmov 2   ;;  %v1089_v63 = vmov 3  }
   0xd   : > { %1054 = vset.pattern.permute.xlu0 %v1086_v3  ;;  %283 = vperm.xlu2 %1056, %v1131_v0   ;;  %v1170_v7 = vld [vmem:[%s1707_s1 + $0x40] sm:$0xff]  ;;  %v1175_v8 = vld [vmem:[%s1707_s1 + $0x38] sm:$0xff]  ;;  %v1180_v9 = vld [vmem:[%s1707_s1 + $0x30] sm:$0xff] }
   0xe   : > { %273 = vperm.xlu1 %1055, %v1136_v1   ;;  %263 = vperm.xlu0 %1054, %v1141_v2   ;;  %v1188_v10 = vld [vmem:[%s1707_s1 + $0x58] sm:$0xff]  ;;  %v1193_v11 = vld [vmem:[%s1707_s1 + $0x50] sm:$0xff]  ;;  %v1198_v12 = vld [vmem:[%s1707_s1 + $0x48] sm:$0xff]  ;;  %s1729_s13 = smov (!%p217_p3, %s1036_s13), 3 }
   0xf   : > { %v1206_v13 = vld [vmem:[%s1707_s1 + $0x70] sm:$0xff]  ;;  %v1211_v14 = vld [vmem:[%s1707_s1 + $0x68] sm:$0xff]  ;;  %v1216_v15 = vld [vmem:[%s1707_s1 + $0x60] sm:$0xff]  ;;  %s1037_s14 = sshll.u32 %s1729_s13, 2  ;;  %s1039_s23 = sshll.u32 %s1729_s13, 3 }
  0x10   : > { %v246_v16 = vld [vmem:[%s1708_s2 + $0x8] sm:$0xff]  ;;  %v245_v17 = vld [vmem:[%s1708_s2] sm:$0xff]  ;;  %v1230_v18 = vld [vmem:[%s1707_s1 + $0x78] sm:$0xff]  ;;  %s220_s16 = scalar_lea.vmem %s1706_s0, %s1037_s14  ;;  %s226_s26 = scalar_lea.vmem %s1711_s5, %s1039_s23 }
  0x11   : > { %v249_v19 = vld [vmem:[%s1708_s2 + $0x20] sm:$0xff]  ;;  %v248_v20 = vld [vmem:[%s1708_s2 + $0x18] sm:$0xff]  ;;  %v247_v21 = vld [vmem:[%s1708_s2 + $0x10] sm:$0xff] }
  0x12   : > { %v252_v22 = vld [vmem:[%s1708_s2 + $0x38] sm:$0xff]  ;;  %v251_v23 = vld [vmem:[%s1708_s2 + $0x30] sm:$0xff]  ;;  %v250_v24 = vld [vmem:[%s1708_s2 + $0x28] sm:$0xff] }
  0x13   : > { %v255_v25 = vld [vmem:[%s1708_s2 + $0x50] sm:$0xff]  ;;  %v254_v26 = vld [vmem:[%s1708_s2 + $0x48] sm:$0xff]  ;;  %v253_v27 = vld [vmem:[%s1708_s2 + $0x40] sm:$0xff] }
  0x14   : > { %v258_v28 = vld [vmem:[%s1708_s2 + $0x68] sm:$0xff]  ;;  %v257_v29 = vld [vmem:[%s1708_s2 + $0x60] sm:$0xff]  ;;  %v256_v30 = vld [vmem:[%s1708_s2 + $0x58] sm:$0xff] }
  0x15   : > { %288 = vperm.xlu2 %1056, %v1152_v4   ;;  %v260_v31 = vld [vmem:[%s1708_s2 + $0x78] sm:$0xff]  ;;  %v259_v32 = vld [vmem:[%s1708_s2 + $0x70] sm:$0xff]  ;;  %v1304_v40 = vld [vmem:[%s220_s16] sm:$0xff] }
  0x16   : > { %278 = vperm.xlu1 %1055, %v1157_v5   ;;  %268 = vperm.xlu0 %1054, %v1162_v6   ;;  %v342_v41 = vperm.slane %v1304_v40, 0  ;;  %v343_v42 = vperm.slane %v1304_v40, 4 }
  0x18   : > { %v1313_v46 = vperm.slane %v342_v41, 0  ;;  %v1315_v47 = vperm.slane %v343_v42, 0 }
  0x1d   : > { %303 = vperm.xlu2 %1056, %v1170_v7  }
  0x1e   : > { %298 = vperm.xlu1 %1055, %v1175_v8   ;;  %293 = vperm.xlu0 %1054, %v1180_v9  }
  0x25   : > { %318 = vperm.xlu2 %1056, %v1188_v10  }
  0x26   : > { %313 = vperm.xlu1 %1055, %v1193_v11   ;;  %308 = vperm.xlu0 %1054, %v1198_v12  }
  0x2d   : > { %333 = vperm.xlu2 %1056, %v1206_v13  }
  0x2e   : > { %328 = vperm.xlu1 %1055, %v1211_v14   ;;  %323 = vperm.xlu0 %1054, %v1216_v15  }
  0x35   : > { %387 = vperm.xlu2 %1056, %v246_v16  }
  0x36   : > { %382 = vperm.xlu1 %1055, %v245_v17   ;;  %338 = vperm.xlu0 %1054, %v1230_v18  }
  0x3d   : > { %402 = vperm.xlu2 %1056, %v249_v19  }
  0x3e   : > { %397 = vperm.xlu1 %1055, %v248_v20   ;;  %392 = vperm.xlu0 %1054, %v247_v21  }
  0x45   : > { %417 = vperm.xlu2 %1056, %v252_v22  }
  0x46   : > { %412 = vperm.xlu1 %1055, %v251_v23   ;;  %407 = vperm.xlu0 %1054, %v250_v24  }
  0x4d   : > { %432 = vperm.xlu2 %1056, %v255_v25  }
  0x4e   : > { %427 = vperm.xlu1 %1055, %v254_v26   ;;  %422 = vperm.xlu0 %1054, %v253_v27  }
  0x55   : > { %447 = vperm.xlu2 %1056, %v258_v28  }
  0x56   : > { %442 = vperm.xlu1 %1055, %v257_v29   ;;  %437 = vperm.xlu0 %1054, %v256_v30  }
  0x5d   : > { %1057 = vset.pattern.permute.xlu2 %v1087_v33 }
  0x5e   : > { %457 = vperm.xlu1 %1055, %v260_v31   ;;  %452 = vperm.xlu0 %1054, %v259_v32  }
  0x5f   : > { %493 = vperm.xlu2 %1057, %v1141_v2  }
  0x66   : > { %1059 = vset.pattern.permute.xlu1 %v1087_v33  ;;  %1058 = vset.pattern.permute.xlu0 %v1087_v33 }
  0x67   : > { %501 = vperm.xlu1 %1059, %v1136_v1   ;;  %505 = vperm.xlu2 %1057, %v1157_v5   ;;  %v284_v34 = vpop.permute.xlu2 %283 }
  0x68   : > { %497 = vperm.xlu0 %1058, %v1162_v6   ;;  %v356_v56 = vmul.f32 %v1313_v46, %v284_v34  ;;  %v357_v57 = vmul.f32 %v1315_v47, %v284_v34 }
  0x6f   : > { %509 = vperm.xlu1 %1059, %v1131_v0   ;;  %513 = vperm.xlu2 %1057, %v1152_v4   ;;  %v1281_v35 = vpop.permute.xlu2 %288 }
  0x70   : > { %517 = vperm.xlu0 %1058, %v1180_v9  }
  0x77   : > { %521 = vperm.xlu1 %1059, %v1175_v8   ;;  %525 = vperm.xlu2 %1057, %v1170_v7   ;;  %v1288_v36 = vpop.permute.xlu2 %303 }
  0x78   : > { %529 = vperm.xlu0 %1058, %v1198_v12  }
  0x7f   : > { %533 = vperm.xlu1 %1059, %v1193_v11   ;;  %537 = vperm.xlu2 %1057, %v1188_v10   ;;  %v1296_v37 = vpop.permute.xlu2 %318 }
  0x80   : > { %541 = vperm.xlu0 %1058, %v1216_v15   ;;  %v1302_v38 = vpop.permute.xlu1 %273  ;;  %v264_v39 = vpop.permute.xlu0 %263 }
  0x81   : > { %v349_v24 = vmul.f32 %v1315_v47, %v264_v39  ;;  %v352_v34 = vmul.f32 %v1313_v46, %v1302_v38 }
  0x87   : > { %545 = vperm.xlu1 %1059, %v1211_v14   ;;  %549 = vperm.xlu2 %1057, %v1206_v13   ;;  %v1310_v43 = vpop.permute.xlu2 %333 }
  0x88   : > { %553 = vperm.xlu0 %1058, %v1230_v18   ;;  %v279_v44 = vpop.permute.xlu1 %278  ;;  %v269_v45 = vpop.permute.xlu0 %268 }
  0x89   : > { %v350_v48 = vmul.f32 %v1313_v46, %v269_v45  ;;  %v351_v49 = vmul.f32 %v1315_v47, %v269_v45  ;;  %v354_v41 = vmul.f32 %v1313_v46, %v279_v44 }
  0x8f   : > { %1060 = vset.pattern.permute.xlu1 %v1088_v50  ;;  %1061 = vset.pattern.permute.xlu2 %v1088_v50  ;;  %v388_v51 = vpop.permute.xlu2 %387 }
  0x90   : > { %1063 = vset.pattern.permute.xlu0 %v1088_v50  ;;  %v1322_v52 = vadd.f32 %v388_v51, %v350_v48  ;;  %v1324_v53 = vadd.f32 %v388_v51, %v351_v49  ;;  %687 = vperm.xlu1 %1060, %v1230_v18   ;;  %v299_v54 = vpop.permute.xlu1 %298  ;;  %v1327_v55 = vpop.permute.xlu0 %293 }
  0x91   : > { %683 = vperm.xlu2 %1061, %v1206_v13   ;;  %671 = vperm.xlu0 %1063, %v1188_v10   ;;  %v362_v16 = vmul.f32 %v1313_v46, %v299_v54  ;;  %v363_v17 = vmul.f32 %v1315_v47, %v299_v54 }
  0x97   : > { %v403_v58 = vpop.permute.xlu2 %402 }
  0x98   : > { %v1333_v59 = vadd.f32 %v403_v58, %v356_v56  ;;  %v1335_v60 = vadd.f32 %v403_v58, %v357_v57  ;;  %679 = vperm.xlu1 %1060, %v1211_v14   ;;  %v314_v61 = vpop.permute.xlu1 %313  ;;  %v1338_v62 = vpop.permute.xlu0 %308  ;;  %v360_v58 = vmul.f32 %v1313_v46, %v1327_v55 }
  0x99   : > { %1062 = vset.pattern.permute.xlu2 %v1089_v63  ;;  %651 = vperm.xlu0 %1063, %v1180_v9   ;;  %v368_v25 = vmul.f32 %v1313_v46, %v314_v61  ;;  %v369_v26 = vmul.f32 %v1315_v47, %v314_v61  ;;  %v361_v61 = vmul.f32 %v1315_v47, %v1327_v55 }
  0x9a   : > { %817 = vperm.xlu2 %1062, %v1206_v13   ;;  %v348_v13 = vmul.f32 %v1313_v46, %v264_v39  ;;  %v353_v39 = vmul.f32 %v1315_v47, %v1302_v38  ;;  %v556_v38 = vperm.slane %v1304_v40, 1 }
  0x9f   : > { %v418_v19 = vpop.permute.xlu2 %417 }
  0xa0   : > { %v1345_v20 = vadd.f32 %v418_v19, %v362_v16  ;;  %v1347_v21 = vadd.f32 %v418_v19, %v363_v17  ;;  %675 = vperm.xlu1 %1060, %v1216_v15   ;;  %v329_v22 = vpop.permute.xlu1 %328  ;;  %v1350_v23 = vpop.permute.xlu0 %323  ;;  %v1395_v16 = vperm.slane %v556_v38, 1  ;;  %v359_v19 = vmul.f32 %v1315_v47, %v1281_v35 }
  0xa1   : > { %1068 = vset.pattern.permute.xlu0 %v1089_v63  ;;  %v374_v32 = vmul.f32 %v1313_v46, %v329_v22  ;;  %v375_v33 = vmul.f32 %v1315_v47, %v329_v22 }
  0xa2   : > { %813 = vperm.xlu2 %1062, %v1211_v14   ;;  %821 = vperm.xlu0 %1068, %v1230_v18  }
  0xa7   : > { %v433_v27 = vpop.permute.xlu2 %432 }
  0xa8   : > { %v1359_v28 = vadd.f32 %v433_v27, %v368_v25  ;;  %v1361_v29 = vadd.f32 %v433_v27, %v369_v26  ;;  %1064 = vset.pattern.permute.xlu1 %v1089_v63  ;;  %v383_v30 = vpop.permute.xlu1 %382  ;;  %v1364_v31 = vpop.permute.xlu0 %338 }
  0xa9   : > { %v460_v14 = vadd.f32 %v383_v30, %v348_v13  ;;  %v461_v18 = vadd.f32 %v383_v30, %v349_v24  ;;  %809 = vperm.xlu1 %1064, %v1216_v15   ;;  %v355_v15 = vmul.f32 %v1315_v47, %v279_v44  ;;  %v557_v44 = vperm.slane %v1304_v40, 5 }
  0xaa   : > { %1065 = vset.pattern.permute.xlu2 %v1088_v50  ;;  %801 = vperm.xlu0 %1068, %v1193_v11  }
  0xab   : > { %667 = vperm.xlu2 %1065, %v1193_v11   ;;  %v1397_v17 = vperm.slane %v557_v44, 1 }
  0xaf   : > { %v448_v42 = vpop.permute.xlu2 %447 }
  0xb0   : > { %v1378_v45 = vadd.f32 %v448_v42, %v374_v32  ;;  %v1380_v48 = vadd.f32 %v448_v42, %v375_v33  ;;  %v398_v11 = vpop.permute.xlu1 %397  ;;  %v393_v49 = vpop.permute.xlu0 %392 }
  0xb1   : > { %v466_v51 = vadd.f32 %v398_v11, %v354_v41  ;;  %v467_v54 = vadd.f32 %v398_v11, %v355_v15  ;;  %v1382_v56 = vadd.f32 %v393_v49, %v352_v34  ;;  %v1384_v57 = vadd.f32 %v393_v49, %v353_v39  ;;  %805 = vperm.xlu1 %1064, %v1188_v10  }
  0xb2   : > { %781 = vperm.xlu0 %1068, %v1152_v4   ;;  %v358_v10 = vmul.f32 %v1313_v46, %v1281_v35  ;;  %v364_v34 = vmul.f32 %v1313_v46, %v1288_v36  ;;  %v365_v39 = vmul.f32 %v1315_v47, %v1288_v36  ;;  %v366_v41 = vmul.f32 %v1313_v46, %v1338_v62 }
  0xb3   : > { %663 = vperm.xlu2 %1065, %v1198_v12   ;;  %v367_v15 = vmul.f32 %v1315_v47, %v1338_v62 }
  0xb8   : > { %v413_v22 = vpop.permute.xlu1 %412  ;;  %v408_v13 = vpop.permute.xlu0 %407 }
  0xb9   : > { %v1403_v24 = vadd.f32 %v413_v22, %v360_v58  ;;  %v1405_v25 = vadd.f32 %v413_v22, %v361_v61  ;;  %v470_v26 = vadd.f32 %v408_v13, %v358_v10  ;;  %v471_v27 = vadd.f32 %v408_v13, %v359_v19  ;;  %1066 = vset.pattern.permute.xlu1 %v1088_v50  ;;  %v494_v55 = vpop.permute.xlu2 %493 }
  0xba   : > { %v562_v30 = vmul.f32 %v1395_v16, %v494_v55  ;;  %v563_v32 = vmul.f32 %v1397_v17, %v494_v55  ;;  %1073 = vset.pattern.permute.xlu0 %v1088_v50  ;;  %659 = vperm.xlu1 %1066, %v1170_v7   ;;  %v370_v61 = vmul.f32 %v1313_v46, %v1296_v37 }
  0xbb   : > { %1067 = vset.pattern.permute.xlu2 %v1089_v63  ;;  %631 = vperm.xlu0 %1073, %v1162_v6   ;;  %v371_v10 = vmul.f32 %v1315_v47, %v1296_v37  ;;  %v372_v19 = vmul.f32 %v1313_v46, %v1350_v23  ;;  %v373_v22 = vmul.f32 %v1315_v47, %v1350_v23 }
  0xbc   : > { %v1414_v35 = vadd.f32 %v562_v30, %v460_v14  ;;  %v1416_v33 = vadd.f32 %v563_v32, %v461_v18  ;;  %797 = vperm.xlu2 %1067, %v1198_v12  }
  0xbe   : > { %1712 = vst [vmem:[#allocation2_spill] sm:$0xff] %v1414_v35 }
  0xbf   : > { %1713 = vst [vmem:[#allocation3_spill] sm:$0xff] %v1416_v33 }
  0xc0   : > { %v428_v42 = vpop.permute.xlu1 %427  ;;  %v423_v11 = vpop.permute.xlu0 %422 }
  0xc1   : > { %v1427_v14 = vadd.f32 %v428_v42, %v366_v41  ;;  %v1429_v18 = vadd.f32 %v428_v42, %v367_v15  ;;  %v476_v49 = vadd.f32 %v423_v11, %v364_v34  ;;  %v477_v12 = vadd.f32 %v423_v11, %v365_v39  ;;  %v506_v38 = vpop.permute.xlu2 %505 }
  0xc2   : > { %v568_v44 = vmul.f32 %v1395_v16, %v506_v38  ;;  %v569_v58 = vmul.f32 %v1397_v17, %v506_v38  ;;  %655 = vperm.xlu1 %1066, %v1175_v8  }
  0xc3   : > { %1077 = vset.pattern.permute.xlu0 %v1086_v3 }
  0xc4   : > { %v1435_v36 = vadd.f32 %v568_v44, %v466_v51  ;;  %v1437_v62 = vadd.f32 %v569_v58, %v467_v54  ;;  %793 = vperm.xlu2 %1067, %v1170_v7  }
  0xc6   : > { %1714 = vst [vmem:[#allocation4_spill] sm:$0xff] %v1435_v36 }
  0xc7   : > { %1715 = vst [vmem:[#allocation5_spill] sm:$0xff] %v1437_v62 }
  0xc8   : > { %v443_v13 = vpop.permute.xlu1 %442  ;;  %v438_v3 = vpop.permute.xlu0 %437 }
  0xc9   : > { %v1448_v51 = vadd.f32 %v443_v13, %v372_v19  ;;  %v1450_v54 = vadd.f32 %v443_v13, %v373_v22  ;;  %v1452_v55 = vadd.f32 %v438_v3, %v370_v61  ;;  %v1454_v7 = vadd.f32 %v438_v3, %v371_v10  ;;  %v514_v30 = vpop.permute.xlu2 %513 }
  0xca   : > { %v572_v32 = vmul.f32 %v1395_v16, %v514_v30  ;;  %v573_v37 = vmul.f32 %v1397_v17, %v514_v30  ;;  %1069 = vset.pattern.permute.xlu1 %v1089_v63 }
  0xcb   : > { %789 = vperm.xlu1 %1069, %v1175_v8  }
  0xcc   : > { %v1460_v23 = vadd.f32 %v572_v32, %v470_v26  ;;  %v1462_v34 = vadd.f32 %v573_v37, %v471_v27  ;;  %1070 = vset.pattern.permute.xlu2 %v1088_v50 }
  0xcd   : > { %647 = vperm.xlu2 %1070, %v1152_v4  }
  0xd0   : > { %v1466_v39 = vpop.permute.xlu1 %457  ;;  %v1468_v41 = vpop.permute.xlu0 %452 }
  0xd1   : > { %v526_v15 = vpop.permute.xlu2 %525 }
  0xd2   : > { %v578_v42 = vmul.f32 %v1395_v16, %v526_v15  ;;  %v579_v11 = vmul.f32 %v1397_v17, %v526_v15 }
  0xd3   : > { %785 = vperm.xlu1 %1069, %v1180_v9  }
  0xd4   : > { %v1473_v8 = vadd.f32 %v578_v42, %v476_v49  ;;  %v1475_v26 = vadd.f32 %v579_v11, %v477_v12 }
  0xd5   : > { %643 = vperm.xlu2 %1070, %v1131_v0  }
  0xd9   : > { %v502_v27 = vpop.permute.xlu1 %501  ;;  %v1478_v38 = vpop.permute.xlu2 %537 }
  0xda   : > { %v566_v4 = vmul.f32 %v1395_v16, %v502_v27  ;;  %v567_v44 = vmul.f32 %v1397_v17, %v502_v27  ;;  %v498_v58 = vpop.permute.xlu0 %497 }
  0xdb   : > { %v564_v61 = vmul.f32 %v1395_v16, %v498_v58  ;;  %v565_v10 = vmul.f32 %v1397_v17, %v498_v58  ;;  %1071 = vset.pattern.permute.xlu1 %v1088_v50 }
  0xdc   : > { %v1486_v9 = vadd.f32 %v566_v4, %v1382_v56  ;;  %v1489_v49 = vadd.f32 %v567_v44, %v1384_v57  ;;  %639 = vperm.xlu1 %1071, %v1157_v5  }
  0xdd   : > { %v1493_v12 = vadd.f32 %v564_v61, %v1322_v52  ;;  %v1496_v19 = vadd.f32 %v565_v10, %v1324_v53  ;;  %1072 = vset.pattern.permute.xlu2 %v1089_v63  ;;  %v691_v61 = vperm.slane %v1304_v40, 6 }
  0xde   : > { %1716 = vst [vmem:[#allocation6_spill] sm:$0xff] %v1486_v9  ;;  %777 = vperm.xlu2 %1072, %v1131_v0  }
  0xdf   : > { %1717 = vst [vmem:[#allocation7_spill] sm:$0xff] %v1489_v49 }
  0xe0   : > { %1718 = vst [vmem:[#allocation8_spill] sm:$0xff] %v1493_v12 }
  0xe1   : > { %1719 = vst [vmem:[#allocation9_spill] sm:$0xff] %v1496_v19  ;;  %v510_v22 = vpop.permute.xlu1 %509  ;;  %v550_v13 = vpop.permute.xlu2 %549 }
  0xe2   : > { %v570_v56 = vmul.f32 %v1395_v16, %v510_v22  ;;  %v571_v3 = vmul.f32 %v1397_v17, %v510_v22  ;;  %v518_v57 = vpop.permute.xlu0 %517  ;;  %v376_v22 = vmul.f32 %v1313_v46, %v1310_v43 }
  0xe3   : > { %v574_v30 = vmul.f32 %v1395_v16, %v518_v57  ;;  %v575_v32 = vmul.f32 %v1397_v17, %v518_v57  ;;  %v379_v57 = vmul.f32 %v1315_v47, %v1364_v31 }
  0xe4   : > { %v1505_v52 = vadd.f32 %v570_v56, %v1333_v59  ;;  %v1508_v53 = vadd.f32 %v571_v3, %v1335_v60  ;;  %635 = vperm.xlu1 %1071, %v1136_v1   ;;  %v378_v3 = vmul.f32 %v1313_v46, %v1364_v31 }
  0xe5   : > { %v1512_v0 = vadd.f32 %v574_v30, %v1403_v24  ;;  %v1515_v37 = vadd.f32 %v575_v32, %v1405_v25  ;;  %v824_v30 = vperm.slane %v1304_v40, 3  ;;  %v825_v32 = vperm.slane %v1304_v40, 7 }
  0xe6   : > { %773 = vperm.xlu2 %1072, %v1157_v5  }
  0xe7   : > { %v1571_v35 = vperm.slane %v824_v30, 3  ;;  %v1573_v19 = vperm.slane %v825_v32, 3 }
  0xe9   : > { %v522_v15 = vpop.permute.xlu1 %521 }
  0xea   : > { %v576_v42 = vmul.f32 %v1395_v16, %v522_v15  ;;  %v577_v11 = vmul.f32 %v1397_v17, %v522_v15  ;;  %v1520_v59 = vpop.permute.xlu0 %529 }
  0xeb   : > { %v684_v27 = vpop.permute.xlu2 %683 }
  0xec   : > { %v1523_v60 = vadd.f32 %v576_v42, %v1345_v20  ;;  %v1526_v4 = vadd.f32 %v577_v11, %v1347_v21  ;;  %1074 = vset.pattern.permute.xlu1 %v1089_v63  ;;  %v590_v42 = vmul.f32 %v1395_v16, %v550_v13  ;;  %v490_v11 = vadd.f32 %v1466_v39, %v378_v3 }
  0xed   : > { %769 = vperm.xlu1 %1074, %v1136_v1  }
  0xee   : > { %1075 = vset.pattern.permute.xlu2 %v1088_v50  ;;  %v690_v50 = vperm.slane %v1304_v40, 2 }
  0xef   : > { %627 = vperm.xlu2 %1075, %v1141_v2  }
  0xf1   : > { %v1532_v5 = vpop.permute.xlu1 %533 }
  0xf2   : > { %v1534_v24 = vpop.permute.xlu0 %541 }
  0xf4   : > { %v818_v25 = vpop.permute.xlu2 %817 }
  0xf5   : > { %765 = vperm.xlu1 %1074, %v1162_v6   ;;  %v377_v6 = vmul.f32 %v1315_v47, %v1310_v43  ;;  %v591_v43 = vmul.f32 %v1397_v17, %v550_v13  ;;  %v858_v62 = vmul.f32 %v1571_v35, %v818_v25 }
  0xf7   : > { %1076 = vset.pattern.permute.xlu2 %v1089_v63  ;;  %v1549_v63 = vperm.slane %v690_v50, 2  ;;  %v491_v50 = vadd.f32 %v1466_v39, %v379_v57  ;;  %v489_v46 = vadd.f32 %v1468_v41, %v377_v6 }
  0xf8   : > { %761 = vperm.xlu2 %1076, %v1141_v2   ;;  %v1551_v2 = vperm.slane %v691_v61, 2  ;;  %v488_v61 = vadd.f32 %v1468_v41, %v376_v22 }
  0xf9   : > { %v546_v20 = vpop.permute.xlu1 %545  ;;  %v724_v47 = vmul.f32 %v1549_v63, %v684_v27  ;;  %v623_v22 = vadd.f32 %v591_v43, %v489_v46 }
  0xfa   : > { %v554_v21 = vpop.permute.xlu0 %553  ;;  %v725_v31 = vmul.f32 %v1551_v2, %v684_v27  ;;  %v588_v13 = vmul.f32 %v1395_v16, %v546_v20  ;;  %v589_v39 = vmul.f32 %v1397_v17, %v546_v20  ;;  %v622_v3 = vadd.f32 %v590_v42, %v488_v61 }
  0xfb   : > { %v592_v40 = vmul.f32 %v1395_v16, %v554_v21  ;;  %v593_v33 = vmul.f32 %v1397_v17, %v554_v21  ;;  %v859_v20 = vmul.f32 %v1573_v19, %v818_v25  ;;  %v584_v25 = vmul.f32 %v1395_v16, %v1478_v38 }
  0xfc   : > { %v814_v44 = vpop.permute.xlu2 %813  ;;  %v756_v21 = vadd.f32 %v724_v47, %v622_v3  ;;  %v757_v30 = vadd.f32 %v725_v31, %v623_v22  ;;  %v620_v42 = vadd.f32 %v588_v13, %v1378_v45  ;;  %v621_v43 = vadd.f32 %v589_v39, %v1380_v48 }
  0xfd   : > { %v624_v32 = vadd.f32 %v592_v40, %v490_v11  ;;  %v625_v49 = vadd.f32 %v593_v33, %v491_v50  ;;  %v857_v61 = vmul.f32 %v1573_v19, %v814_v44  ;;  %v586_v45 = vmul.f32 %v1395_v16, %v1534_v24 }
  0xfe   : > { %v587_v48 = vmul.f32 %v1397_v17, %v1534_v24  ;;  %v890_v40 = vadd.f32 %v858_v62, %v756_v21  ;;  %v891_v13 = vadd.f32 %v859_v20, %v757_v30  ;;  %v616_v24 = vadd.f32 %v584_v25, %v1452_v55 }
 0x100   : > { %v922_v21 = vmax.f32 %v890_v40, 0.0  ;;  %v923_v30 = vmax.f32 %v891_v13, 0.0 }
 0x102   : > { %v688_v58 = vpop.permute.xlu1 %687 }
 0x103   : > { %v1539_v1 = vpop.permute.xlu0 %671  ;;  %v726_v41 = vmul.f32 %v1549_v63, %v688_v58  ;;  %v727_v6 = vmul.f32 %v1551_v2, %v688_v58  ;;  %v856_v58 = vmul.f32 %v1571_v35, %v814_v44 }
 0x105   : > { %v1543_v10 = vpop.permute.xlu2 %667  ;;  %v758_v46 = vadd.f32 %v726_v41, %v624_v32  ;;  %v759_v36 = vadd.f32 %v727_v6, %v625_v49  ;;  %v619_v32 = vadd.f32 %v587_v48, %v1450_v54  ;;  %v583_v54 = vmul.f32 %v1397_v17, %v1532_v5 }
 0x107   : > { %v615_v48 = vadd.f32 %v583_v54, %v1361_v29 }
 0x10a   : > { %v680_v56 = vpop.permute.xlu1 %679 }
 0x10b   : > { %v1559_v15 = vpop.permute.xlu0 %651  ;;  %v722_v27 = vmul.f32 %v1549_v63, %v680_v56  ;;  %v723_v57 = vmul.f32 %v1551_v2, %v680_v56 }
 0x10d   : > { %v1581_v12 = vpop.permute.xlu2 %663  ;;  %v754_v47 = vadd.f32 %v722_v27, %v620_v42  ;;  %v755_v31 = vadd.f32 %v723_v57, %v621_v43  ;;  %v585_v27 = vmul.f32 %v1397_v17, %v1478_v38  ;;  %v618_v57 = vadd.f32 %v586_v45, %v1448_v51 }
 0x10e   : > { %v582_v51 = vmul.f32 %v1395_v16, %v1532_v5  ;;  %v717_v5 = vmul.f32 %v1551_v2, %v1543_v10 }
 0x10f   : > { %v888_v41 = vadd.f32 %v856_v58, %v754_v47  ;;  %v889_v6 = vadd.f32 %v857_v61, %v755_v31  ;;  %v581_v61 = vmul.f32 %v1397_v17, %v1520_v59  ;;  %v719_v31 = vmul.f32 %v1551_v2, %v1539_v1 }
 0x110   : > { %v614_v45 = vadd.f32 %v582_v51, %v1359_v28  ;;  %v749_v28 = vadd.f32 %v717_v5, %v615_v48 }
 0x111   : > { %v920_v55 = vmax.f32 %v888_v41, 0.0  ;;  %v921_v58 = vmax.f32 %v889_v6, 0.0 }
 0x112   : > { %v676_v9 = vpop.permute.xlu1 %675 }
 0x113   : > { %v720_v49 = vmul.f32 %v1549_v63, %v676_v9  ;;  %v721_v39 = vmul.f32 %v1551_v2, %v676_v9 }
 0x114   : > { %v822_v56 = vpop.permute.xlu0 %821 }
 0x115   : > { %v860_v33 = vmul.f32 %v1571_v35, %v822_v56  ;;  %v861_v11 = vmul.f32 %v1573_v19, %v822_v56  ;;  %v752_v20 = vadd.f32 %v720_v49, %v618_v57  ;;  %v753_v42 = vadd.f32 %v721_v39, %v619_v32 }
 0x116   : > { %v798_v62 = vpop.permute.xlu2 %797  ;;  %v718_v56 = vmul.f32 %v1549_v63, %v1539_v1  ;;  %v714_v1 = vmul.f32 %v1549_v63, %v1581_v12 }
 0x117   : > { %v892_v50 = vadd.f32 %v860_v33, %v758_v46  ;;  %v893_v44 = vadd.f32 %v861_v11, %v759_v36  ;;  %v580_v36 = vmul.f32 %v1395_v16, %v1520_v59  ;;  %v716_v16 = vmul.f32 %v1549_v63, %v1543_v10 }
 0x118   : > { %v617_v11 = vadd.f32 %v585_v27, %v1454_v7  ;;  %v613_v10 = vadd.f32 %v581_v61, %v1429_v18  ;;  %v848_v29 = vmul.f32 %v1571_v35, %v798_v62  ;;  %v849_v39 = vmul.f32 %v1573_v19, %v798_v62 }
 0x119   : > { %v924_v3 = vmax.f32 %v892_v50, 0.0  ;;  %v925_v22 = vmax.f32 %v893_v44, 0.0  ;;  %v612_v17 = vadd.f32 %v580_v36, %v1427_v14  ;;  %v715_v50 = vmul.f32 %v1551_v2, %v1581_v12 }
 0x11a   : > { %v750_v14 = vadd.f32 %v718_v56, %v616_v24  ;;  %v751_v40 = vadd.f32 %v719_v31, %v617_v11  ;;  %v748_v13 = vadd.f32 %v716_v16, %v614_v45 }
 0x11b   : > { %933 = vmatpush.msra.mxu0 %v924_v3  ;;  %953 = vmatpush.msra.mxu1 %v925_v22  ;;  %v810_v9 = vpop.permute.xlu1 %809  ;;  %v746_v18 = vadd.f32 %v714_v1, %v612_v17  ;;  %v747_v22 = vadd.f32 %v715_v50, %v613_v10 }
 0x11c   : > { %v854_v43 = vmul.f32 %v1571_v35, %v810_v9  ;;  %v855_v38 = vmul.f32 %v1573_v19, %v810_v9  ;;  %v802_v33 = vpop.permute.xlu0 %801 }
 0x11d   : > { %934 = vmatpush.msra.mxu0 %v922_v21  ;;  %954 = vmatpush.msra.mxu1 %v923_v30  ;;  %v850_v44 = vmul.f32 %v1571_v35, %v802_v33  ;;  %v851_v7 = vmul.f32 %v1573_v19, %v802_v33  ;;  %v880_v9 = vadd.f32 %v848_v29, %v746_v18 }
 0x11e   : > { %v886_v46 = vadd.f32 %v854_v43, %v752_v20  ;;  %v887_v47 = vadd.f32 %v855_v38, %v753_v42  ;;  %v794_v41 = vpop.permute.xlu2 %793  ;;  %v881_v21 = vadd.f32 %v849_v39, %v747_v22 }
 0x11f   : > { %935 = vmatpush.msra.mxu0 %v920_v55  ;;  %955 = vmatpush.msra.mxu1 %v921_v58  ;;  %v882_v57 = vadd.f32 %v850_v44, %v748_v13  ;;  %v883_v32 = vadd.f32 %v851_v7, %v749_v28  ;;  %v912_v42 = vmax.f32 %v880_v9, 0.0  ;;  %v846_v38 = vmul.f32 %v1571_v35, %v794_v41 }
 0x120   : > { %v918_v59 = vmax.f32 %v886_v46, 0.0  ;;  %v919_v25 = vmax.f32 %v887_v47, 0.0  ;;  %v913_v43 = vmax.f32 %v881_v21, 0.0  ;;  %v847_v51 = vmul.f32 %v1573_v19, %v794_v41 }
 0x121   : > { %v914_v30 = vmax.f32 %v882_v57, 0.0  ;;  %v915_v20 = vmax.f32 %v883_v32, 0.0  ;;  %v708_v44 = vmul.f32 %v1549_v63, %v1559_v15  ;;  %v709_v7 = vmul.f32 %v1551_v2, %v1559_v15 }
 0x122   : > { %936 = vmatpush.msra.mxu0 %v918_v59  ;;  %956 = vmatpush.msra.mxu1 %v919_v25 }
 0x123   : > { %v806_v49 = vpop.permute.xlu1 %805  ;;  %v740_v15 = vadd.f32 %v708_v44, %v1512_v0 }
 0x124   : > { %v852_v3 = vmul.f32 %v1571_v35, %v806_v49  ;;  %v853_v12 = vmul.f32 %v1573_v19, %v806_v49 }
 0x126   : > { %v884_v6 = vadd.f32 %v852_v3, %v750_v14  ;;  %v885_v27 = vadd.f32 %v853_v12, %v751_v40  ;;  %v782_v14 = vpop.permute.xlu0 %781  ;;  %v741_v12 = vadd.f32 %v709_v7, %v1515_v37 }
 0x127   : > { %v648_v58 = vpop.permute.xlu2 %647  ;;  %v841_v13 = vmul.f32 %v1573_v19, %v782_v14 }
 0x128   : > { %v916_v24 = vmax.f32 %v884_v6, 0.0  ;;  %v917_v36 = vmax.f32 %v885_v27, 0.0  ;;  %v706_v48 = vmul.f32 %v1549_v63, %v648_v58  ;;  %v707_v1 = vmul.f32 %v1551_v2, %v648_v58 }
 0x12a   : > { %937 = vmatpush.msra.mxu0 %v916_v24  ;;  %957 = vmatpush.msra.mxu1 %v917_v36  ;;  %v738_v28 = vadd.f32 %v706_v48, %v1460_v23  ;;  %v739_v49 = vadd.f32 %v707_v1, %v1462_v34  ;;  %v1723_v48 = vld [vmem:[#allocation7_spill] sm:$0xff] }
 0x12c   : > { %v660_v62 = vpop.permute.xlu1 %659  ;;  %938 = vmatpush.msra.mxu0 %v914_v30  ;;  %958 = vmatpush.msra.mxu1 %v915_v20  ;;  %v873_v27 = vadd.f32 %v841_v13, %v739_v49 }
 0x12d   : > { %v712_v54 = vmul.f32 %v1549_v63, %v660_v62  ;;  %v713_v55 = vmul.f32 %v1551_v2, %v660_v62 }
 0x12e   : > { %939 = vmatpush.msra.mxu0 %v912_v42  ;;  %959 = vmatpush.msra.mxu1 %v913_v43  ;;  %v905_v20 = vmax.f32 %v873_v27, 0.0 }
 0x12f   : > { %v744_v61 = vadd.f32 %v712_v54, %v1473_v8  ;;  %v745_v56 = vadd.f32 %v713_v55, %v1475_v26  ;;  %v644_v33 = vpop.permute.xlu2 %643  ;;  %v1720_v55 = vld [vmem:[#allocation4_spill] sm:$0xff] }
 0x130   : > { %v704_v39 = vmul.f32 %v1549_v63, %v644_v33  ;;  %v705_v3 = vmul.f32 %v1551_v2, %v644_v33 }
 0x131   : > { %v878_v46 = vadd.f32 %v846_v38, %v744_v61  ;;  %v879_v47 = vadd.f32 %v847_v51, %v745_v56  ;;  %v1721_v61 = vld [vmem:[#allocation5_spill] sm:$0xff] }
 0x132   : > { %v736_v57 = vadd.f32 %v704_v39, %v1505_v52  ;;  %v737_v32 = vadd.f32 %v705_v3, %v1508_v53  ;;  %v1724_v3 = vld [vmem:[#allocation8_spill] sm:$0xff] }
 0x133   : > { %v910_v31 = vmax.f32 %v878_v46, 0.0  ;;  %v911_v16 = vmax.f32 %v879_v47, 0.0  ;;  %v927_v46 = vld [vmem:[%s1710_s4] sm:$0xff] }
 0x134   : > { %v656_v5 = vpop.permute.xlu1 %655  ;;  %930 = vperm.xlu0 %1077, %v927_v46  }
 0x135   : > { %940 = vmatpush.msra.mxu0 %v910_v31  ;;  %960 = vmatpush.msra.mxu1 %v911_v16  ;;  %v710_v11 = vmul.f32 %v1549_v63, %v656_v5  ;;  %v711_v17 = vmul.f32 %v1551_v2, %v656_v5 }
 0x137   : > { %v742_v25 = vadd.f32 %v710_v11, %v1523_v60  ;;  %v743_v45 = vadd.f32 %v711_v17, %v1526_v4  ;;  %v840_v4 = vmul.f32 %v1571_v35, %v782_v14 }
 0x138   : > { %v778_v29 = vpop.permute.xlu2 %777 }
 0x139   : > { %v838_v22 = vmul.f32 %v1571_v35, %v778_v29  ;;  %v839_v41 = vmul.f32 %v1573_v19, %v778_v29  ;;  %v872_v6 = vadd.f32 %v840_v4, %v738_v28 }
 0x13b   : > { %v870_v37 = vadd.f32 %v838_v22, %v736_v57  ;;  %v871_v21 = vadd.f32 %v839_v41, %v737_v32  ;;  %v904_v30 = vmax.f32 %v872_v6, 0.0  ;;  %v1726_v41 = vld [vmem:[#allocation2_spill] sm:$0xff] }
 0x13d   : > { %v790_v59 = vpop.permute.xlu1 %789  ;;  %v902_v43 = vmax.f32 %v870_v37, 0.0  ;;  %v903_v38 = vmax.f32 %v871_v21, 0.0  ;;  %v926_v21 = vld [vmem:[%s1709_s3] sm:$0xff] }
 0x13e   : > { %v844_v8 = vmul.f32 %v1571_v35, %v790_v59  ;;  %v845_v26 = vmul.f32 %v1573_v19, %v790_v59 }
 0x140   : > { %v876_v50 = vadd.f32 %v844_v8, %v742_v25  ;;  %v877_v10 = vadd.f32 %v845_v26, %v743_v45  ;;  %v774_v62 = vpop.permute.xlu2 %773  ;;  %v632_v45 = vpop.permute.xlu0 %631  ;;  %v1722_v8 = vld [vmem:[#allocation6_spill] sm:$0xff] }
 0x141   : > { %v836_v52 = vmul.f32 %v1571_v35, %v774_v62  ;;  %v837_v53 = vmul.f32 %v1573_v19, %v774_v62  ;;  %v698_v14 = vmul.f32 %v1549_v63, %v632_v45 }
 0x142   : > { %v908_v60 = vmax.f32 %v876_v50, 0.0  ;;  %v909_v40 = vmax.f32 %v877_v10, 0.0 }
 0x144   : > { %941 = vmatpush.msra.mxu0 %v908_v60  ;;  %961 = vmatpush.msra.mxu1 %v909_v40  ;;  %v699_v60 = vmul.f32 %v1551_v2, %v632_v45 }
 0x145   : > { %v786_v18 = vpop.permute.xlu1 %785 }
 0x146   : > { %v842_v23 = vmul.f32 %v1571_v35, %v786_v18  ;;  %v843_v34 = vmul.f32 %v1573_v19, %v786_v18 }
 0x148   : > { %v874_v24 = vadd.f32 %v842_v23, %v740_v15  ;;  %v875_v36 = vadd.f32 %v843_v34, %v741_v12  ;;  %v730_v15 = vadd.f32 %v698_v14, %v1724_v3  ;;  %v1725_v12 = vld [vmem:[#allocation9_spill] sm:$0xff]  ;;  %v1727_v34 = vld [vmem:[#allocation3_spill] sm:$0xff] }
 0x149   : > { %v628_v11 = vpop.permute.xlu2 %627  ;;  %v731_v18 = vadd.f32 %v699_v60, %v1725_v12 }
 0x14a   : > { %v906_v0 = vmax.f32 %v874_v24, 0.0  ;;  %v907_v9 = vmax.f32 %v875_v36, 0.0  ;;  %v696_v4 = vmul.f32 %v1549_v63, %v628_v11  ;;  %v697_v13 = vmul.f32 %v1551_v2, %v628_v11 }
 0x14c   : > { %942 = vmatpush.msra.mxu0 %v906_v0  ;;  %962 = vmatpush.msra.mxu1 %v907_v9  ;;  %v728_v23 = vadd.f32 %v696_v4, %v1726_v41  ;;  %v729_v6 = vadd.f32 %v697_v13, %v1727_v34 }
 0x14e   : > { %v640_v42 = vpop.permute.xlu1 %639  ;;  %943 = vmatpush.msra.mxu0 %v904_v30  ;;  %963 = vmatpush.msra.mxu1 %v905_v20 }
 0x14f   : > { %v702_v51 = vmul.f32 %v1549_v63, %v640_v42  ;;  %v703_v54 = vmul.f32 %v1551_v2, %v640_v42 }
 0x150   : > { %944 = vmatpush.msra.mxu0 %v902_v43  ;;  %964 = vmatpush.msra.mxu1 %v903_v38 }
 0x151   : > { %v734_v58 = vadd.f32 %v702_v51, %v1720_v55  ;;  %v735_v56 = vadd.f32 %v703_v54, %v1721_v61 }
 0x152   : > { %v762_v40 = vpop.permute.xlu2 %761 }
 0x153   : > { %v868_v47 = vadd.f32 %v836_v52, %v734_v58  ;;  %v869_v31 = vadd.f32 %v837_v53, %v735_v56  ;;  %v830_v29 = vmul.f32 %v1571_v35, %v762_v40  ;;  %v831_v39 = vmul.f32 %v1573_v19, %v762_v40 }
 0x155   : > { %v900_v16 = vmax.f32 %v868_v47, 0.0  ;;  %v901_v5 = vmax.f32 %v869_v31, 0.0  ;;  %v862_v32 = vadd.f32 %v830_v29, %v728_v23  ;;  %v863_v24 = vadd.f32 %v831_v39, %v729_v6 }
 0x156   : > { %v636_v33 = vpop.permute.xlu1 %635 }
 0x157   : > { %945 = vmatpush.msra.mxu0 %v900_v16  ;;  %965 = vmatpush.msra.mxu1 %v901_v5  ;;  %v700_v17 = vmul.f32 %v1549_v63, %v636_v33  ;;  %v701_v59 = vmul.f32 %v1551_v2, %v636_v33  ;;  %v894_v9 = vmax.f32 %v862_v32, 0.0  ;;  %v895_v37 = vmax.f32 %v863_v24, 0.0 }
 0x159   : > { %v732_v26 = vadd.f32 %v700_v17, %v1722_v8  ;;  %v733_v1 = vadd.f32 %v701_v59, %v1723_v48 }
 0x15f   : > { %v770_v25 = vpop.permute.xlu1 %769 }
 0x160   : > { %v834_v50 = vmul.f32 %v1571_v35, %v770_v25  ;;  %v835_v10 = vmul.f32 %v1573_v19, %v770_v25 }
 0x162   : > { %v866_v44 = vadd.f32 %v834_v50, %v732_v26  ;;  %v867_v7 = vadd.f32 %v835_v10, %v733_v1 }
 0x164   : > { %v898_v28 = vmax.f32 %v866_v44, 0.0  ;;  %v899_v49 = vmax.f32 %v867_v7, 0.0 }
 0x166   : > { %946 = vmatpush.msra.mxu0 %v898_v28  ;;  %966 = vmatpush.msra.mxu1 %v899_v49 }
 0x167   : > { %v766_v22 = vpop.permute.xlu1 %765 }
 0x168   : > { %v832_v63 = vmul.f32 %v1571_v35, %v766_v22  ;;  %v833_v2 = vmul.f32 %v1573_v19, %v766_v22 }
 0x16a   : > { %v864_v27 = vadd.f32 %v832_v63, %v730_v15  ;;  %v865_v57 = vadd.f32 %v833_v2, %v731_v18 }
 0x16c   : > { %v896_v36 = vmax.f32 %v864_v27, 0.0  ;;  %v897_v0 = vmax.f32 %v865_v57, 0.0 }
 0x16e   : > { %947 = vmatpush.msra.mxu0 %v896_v36  ;;  %967 = vmatpush.msra.mxu1 %v897_v0 }
 0x170   : > { %948 = vmatpush.msra.mxu0 %v894_v9  ;;  %968 = vmatpush.msra.mxu1 %v895_v37 }
 0x171   : > { %949 = vmatmul.f32.vlgmr.msra.gmra.mxu0 %v926_v21  ;;  %969 = vmatmul.f32.vlgmr.msra.gmra.mxu1 %v926_v21 }
 0x1a6   : > { %v931_v35 = vpop.permute.xlu0 %930 }
 0x1ee   : > { %v950_v19 = vpop.f32.mrf.mxu0  ;;  %v970_v30 = vpop.f32.mrf.mxu1 }
 0x1ef   : > { %v951_v20 = vadd.f32 %v950_v19, %v931_v35  ;;  %v971_v62 = vadd.f32 %v970_v30, %v931_v35 }
 0x1f1   : > { %973 = vst [vmem:[%s226_s26] sm:$0xff] %v951_v20 }
 0x1f2   : > { %974 = vst [vmem:[%s226_s26 + $0x8] sm:$0xff] %v971_v62 }
 0x1f3 PF: > { %s15_s18 = sadd.s32 1, %s1084_s18  }
 0x1f4   : > { %p12_p4 = scmp.ge.s32.totalorder %s15_s18, 4  }
 0x1f6   :  { %14 = sbr.rel (!%p12_p4) target bundleno = 1 (0x1), region = 70 }

</bundles_post_ra>
